<compile_context>
chip_gen: v7x
topology: tpu7x:2x2x1
jax: 0.10.0
libtpu: 0.0.40
codegen_flags: <defaults>
</compile_context>

<pallas_src>
import jax
import jax.numpy as jnp
from jax.experimental import pallas as pl
from jax.experimental.pallas import tpu as pltpu

LANES = 1024           # lane width of the 2-D view of the node axis
MAX_BLOCK_ROWS = 256   # 256 x 1024 f32 = 1 MiB per input block (v5e-safe)
_NUM_SUMS = 6          # S_p, S_pp, S_t0, S_t1, S_pt0, S_pt1
_PAD_TGT = 2.0         # sentinel: neither ==0 nor ==1, so padding adds nothing


def _cdiv(a, b):
    return (a + b - 1) // b


def _round_up(a, m):
    return _cdiv(a, m) * m


def _dice_sums_kernel(p_ref, t_ref, out_ref):
    """Accumulate per-lane partial sums over the streaming node blocks.

    Grid: (cores, steps).  Axis 0 is 'parallel' (shardable across TensorCores),
    axis 1 is the serial reduction over row blocks.  The output block is the
    accumulator (its index_map returns the same block for every step k).
    """
    k = pl.program_id(1)

    @pl.when(k == 0)
    def _():
        out_ref[...] = jnp.zeros_like(out_ref)

    p = p_ref[...]                                   # (block_rows, LANES) f32
    t = t_ref[...]
    t0 = (t == 0.0).astype(jnp.float32)
    t1 = (t == 1.0).astype(jnp.float32)

    out_ref[:, 0, :] += jnp.sum(p, axis=0, keepdims=True)          # S_p
    out_ref[:, 1, :] += jnp.sum(p * p, axis=0, keepdims=True)      # S_pp
    out_ref[:, 2, :] += jnp.sum(t0, axis=0, keepdims=True)         # S_t0
    out_ref[:, 3, :] += jnp.sum(t1, axis=0, keepdims=True)         # S_t1
    out_ref[:, 4, :] += jnp.sum(p * t0, axis=0, keepdims=True)     # S_pt0
    out_ref[:, 5, :] += jnp.sum(p * t1, axis=0, keepdims=True)     # S_pt1


def graph_dice_loss(pred, tgt, class_weights=(0.5, 0.5)):
    """pred: (N,) float, tgt: (N,) float (labels, typically {0., 1.})."""
    pred = jnp.asarray(pred, jnp.float32).reshape(-1)
    tgt = jnp.asarray(tgt, jnp.float32).reshape(-1)
    n = pred.shape[0]

    # ---- choose a lane-dense 2-D tiling of the node axis ----
    rows = _cdiv(max(n, 1), LANES)
    if rows <= MAX_BLOCK_ROWS:
        # Small inputs: a single grid step with the whole array as one block
        # (block == full array dims, so no (8,128) divisibility needed).
        num_cores, steps, block_rows = 1, 1, rows
    else:
        num_cores = 2                                    # v7x: 2 TCs/chip
        rows_per_core = _round_up(_cdiv(rows, num_cores), 8)
        steps = _cdiv(rows_per_core, MAX_BLOCK_ROWS)
        block_rows = _round_up(_cdiv(rows_per_core, steps), 8)
    rows_padded = num_cores * steps * block_rows
    n_padded = rows_padded * LANES

    pred2d = jnp.pad(pred, (0, n_padded - n)).reshape(rows_padded, LANES)
    tgt2d = jnp.pad(tgt, (0, n_padded - n),
                    constant_values=_PAD_TGT).reshape(rows_padded, LANES)

    node_spec = pl.BlockSpec((block_rows, LANES),
                             lambda c, k: (c * steps + k, 0))

    sums = pl.pallas_call(
        _dice_sums_kernel,
        out_shape=jax.ShapeDtypeStruct((num_cores, _NUM_SUMS, LANES),
                                       jnp.float32),
        grid_spec=pltpu.PrefetchScalarGridSpec(
            num_scalar_prefetch=0,
            grid=(num_cores, steps),
            in_specs=[node_spec, node_spec],
            out_specs=pl.BlockSpec((1, _NUM_SUMS, LANES),
                                   lambda c, k: (c, 0, 0)),
        ),
        compiler_params=pltpu.CompilerParams(
            dimension_semantics=("parallel", "arbitrary"),
        ),
    )(pred2d, tgt2d)

    # ---- tiny epilogue in plain JAX: combine per-core / per-lane partials ----
    s = jnp.sum(sums, axis=(0, 2))                         # (6,)
    s_p, s_pp, s_t0, s_t1, s_pt0, s_pt1 = (s[0], s[1], s[2], s[3], s[4], s[5])
    n_f = float(n)

    intersect0 = s_t0 - s_pt0                  # sum((1-p) * (t==0))
    intersect1 = s_pt1                         # sum(  p   * (t==1))
    denom0 = (n_f - 2.0 * s_p + s_pp) + s_t0   # sum((1-p)^2) + sum((t==0)^2)
    denom1 = s_pp + s_t1                       # sum(  p ^2) + sum((t==1)^2)

    eps = 1.0                                  # self.epsilon in the module
    dice0 = 2.0 * intersect0 / jnp.maximum(denom0, eps)
    dice1 = 2.0 * intersect1 / jnp.maximum(denom1, eps)
    w0, w1 = class_weights
    return 1.0 - (w0 * dice0 + w1 * dice1)


def graph_dice_loss_ref(pred, tgt, class_weights=jnp.array([0.5, 0.5])):
    """Pure-JAX reference mirroring the PyTorch module."""
    pred = jnp.asarray(pred, jnp.float32)
    tgt = jnp.asarray(tgt, jnp.float32)
    inp = jnp.stack([1.0 - pred, pred], 0)
    target = jnp.stack([tgt == 0, tgt == 1], 0).astype(jnp.float32)
    intersect = (inp * target).sum(-1)
    denominator = (inp * inp).sum(-1) + (target * target).sum(-1)
    dice = 2.0 * (intersect / jnp.maximum(denominator, 1.0))
    dice = (dice * class_weights).sum()
    return 1.0 - dice


if __name__ == "__main__":
    key = jax.random.PRNGKey(0)
    kp, kt = jax.random.split(key)

    # Small case (single-block fast path).
    N = 512
    pred = jax.random.uniform(kp, (N,), dtype=jnp.float32)
    tgt = jax.random.bernoulli(kt, 0.4, (N,)).astype(jnp.float32)

    loss = jax.block_until_ready(graph_dice_loss(pred, tgt))
    ref = graph_dice_loss_ref(pred, tgt)
    assert jnp.allclose(loss, ref, atol=1e-5, rtol=1e-5), (loss, ref)

    # Larger case exercising multi-step streaming, the 2-way core split,
    # and the padding path (N not a multiple of LANES or the block size).
    N2 = 600_000
    kp2, kt2 = jax.random.split(jax.random.PRNGKey(1))
    pred2 = jax.random.uniform(kp2, (N2,), dtype=jnp.float32)
    tgt2 = jax.random.bernoulli(kt2, 0.3, (N2,)).astype(jnp.float32)
    loss2 = jax.block_until_ready(graph_dice_loss(pred2, tgt2))
    ref2 = graph_dice_loss_ref(pred2, tgt2)
    assert jnp.allclose(loss2, ref2, atol=1e-4, rtol=1e-4), (loss2, ref2)

    print("KERNEL_OK")
</pallas_src>

<mosaic_0001>
module attributes {stable_mosaic.version = 11 : i64} {
  func.func @_dice_sums_kernel(%arg0: i32, %arg1: i32, %arg2: memref<1x1024xf32, #tpu.memory_space<vmem>>, %arg3: memref<1x1024xf32, #tpu.memory_space<vmem>>, %arg4: memref<1x6x1024xf32, #tpu.memory_space<vmem>>) attributes {dimension_semantics = [#tpu.dimension_semantics<parallel>, #tpu.dimension_semantics<arbitrary>], iteration_bounds = array<i64: 1, 1>, scalar_prefetch = 0 : i64, scratch_operands = 0 : i64, tpu.core_type = #tpu.core_type<tc>, window_params = [{transform_indices = @transform_0, window_bounds = array<i64: 1, 1024>}, {transform_indices = @transform_1, window_bounds = array<i64: 1, 1024>}, {transform_indices = @transform_2, window_bounds = array<i64: 1, 6, 1024>}]} {
    %c0_i32 = arith.constant 0 : i32
    %0 = arith.cmpi eq, %arg1, %c0_i32 : i32
    %1 = arith.extui %0 : i1 to i32
    %c0_i32_0 = arith.constant 0 : i32
    %2 = arith.cmpi ne, %1, %c0_i32_0 : i32
    scf.if %2 {
      %cst_42 = arith.constant 0.000000e+00 : f32
      %64 = vector.broadcast %cst_42 : f32 to vector<1x6x1024xf32>
      %c0_43 = arith.constant 0 : index
      %c0_44 = arith.constant 0 : index
      %c0_45 = arith.constant 0 : index
      %65 = vector.load %arg4[%c0_43, %c0_44, %c0_45] : memref<1x6x1024xf32, #tpu.memory_space<vmem>>, vector<1x6x1024xf32>
      tpu.vector_store %arg4[%c0_43, %c0_44, %c0_45], %64 {strides = array<i32>} : memref<1x6x1024xf32, #tpu.memory_space<vmem>>, vector<1x6x1024xf32>,
    } else {
    }
    %c0 = arith.constant 0 : index
    %c0_1 = arith.constant 0 : index
    %3 = vector.load %arg2[%c0, %c0_1] : memref<1x1024xf32, #tpu.memory_space<vmem>>, vector<1x1024xf32>
    %c0_2 = arith.constant 0 : index
    %c0_3 = arith.constant 0 : index
    %4 = vector.load %arg3[%c0_2, %c0_3] : memref<1x1024xf32, #tpu.memory_space<vmem>>, vector<1x1024xf32>
    %cst = arith.constant 0.000000e+00 : f32
    %5 = vector.broadcast %cst : f32 to vector<1x1024xf32>
    %6 = arith.cmpf oeq, %4, %5 : vector<1x1024xf32>
    %7 = arith.extui %6 : vector<1x1024xi1> to vector<1x1024xi32>
    %8 = arith.sitofp %7 : vector<1x1024xi32> to vector<1x1024xf32>
    %cst_4 = arith.constant 1.000000e+00 : f32
    %9 = vector.broadcast %cst_4 : f32 to vector<1x1024xf32>
    %10 = arith.cmpf oeq, %4, %9 : vector<1x1024xf32>
    %11 = arith.extui %10 : vector<1x1024xi1> to vector<1x1024xi32>
    %12 = arith.sitofp %11 : vector<1x1024xi32> to vector<1x1024xf32>
    %c0_5 = arith.constant 0 : index
    %c0_6 = arith.constant 0 : index
    %c0_7 = arith.constant 0 : index
    %13 = vector.load %arg4[%c0_5, %c0_6, %c0_7] : memref<1x6x1024xf32, #tpu.memory_space<vmem>>, vector<1x1x1024xf32>
    %14 = vector.shape_cast %13 : vector<1x1x1024xf32> to vector<1x1024xf32>
    %cst_8 = arith.constant dense<0.000000e+00> : vector<1024xf32>
    %15 = vector.multi_reduction <add>, %3, %cst_8 [0] : vector<1x1024xf32> to vector<1024xf32>
    %16 = vector.shape_cast %15 : vector<1024xf32> to vector<1x1024xf32>
    %17 = arith.addf %14, %16 : vector<1x1024xf32>
    %c0_9 = arith.constant 0 : index
    %c0_10 = arith.constant 0 : index
    %c0_11 = arith.constant 0 : index
    %18 = vector.load %arg4[%c0_9, %c0_10, %c0_11] : memref<1x6x1024xf32, #tpu.memory_space<vmem>>, vector<1x1x1024xf32>
    %19 = vector.shape_cast %18 : vector<1x1x1024xf32> to vector<1x1024xf32>
    %20 = vector.shape_cast %17 : vector<1x1024xf32> to vector<1x1x1024xf32>
    tpu.vector_store %arg4[%c0_9, %c0_10, %c0_11], %20 {strides = array<i32>} : memref<1x6x1024xf32, #tpu.memory_space<vmem>>, vector<1x1x1024xf32>,
    %c0_12 = arith.constant 0 : index
    %c1 = arith.constant 1 : index
    %c0_13 = arith.constant 0 : index
    %21 = vector.load %arg4[%c0_12, %c1, %c0_13] : memref<1x6x1024xf32, #tpu.memory_space<vmem>>, vector<1x1x1024xf32>
    %22 = vector.shape_cast %21 : vector<1x1x1024xf32> to vector<1x1024xf32>
    %23 = arith.mulf %3, %3 : vector<1x1024xf32>
    %cst_14 = arith.constant dense<0.000000e+00> : vector<1024xf32>
    %24 = vector.multi_reduction <add>, %23, %cst_14 [0] : vector<1x1024xf32> to vector<1024xf32>
    %25 = vector.shape_cast %24 : vector<1024xf32> to vector<1x1024xf32>
    %26 = arith.addf %22, %25 : vector<1x1024xf32>
    %c0_15 = arith.constant 0 : index
    %c1_16 = arith.constant 1 : index
    %c0_17 = arith.constant 0 : index
    %27 = vector.load %arg4[%c0_15, %c1_16, %c0_17] : memref<1x6x1024xf32, #tpu.memory_space<vmem>>, vector<1x1x1024xf32>
    %28 = vector.shape_cast %27 : vector<1x1x1024xf32> to vector<1x1024xf32>
    %29 = vector.shape_cast %26 : vector<1x1024xf32> to vector<1x1x1024xf32>
    tpu.vector_store %arg4[%c0_15, %c1_16, %c0_17], %29 {strides = array<i32>} : memref<1x6x1024xf32, #tpu.memory_space<vmem>>, vector<1x1x1024xf32>,
    %c0_18 = arith.constant 0 : index
    %c2 = arith.constant 2 : index
    %c0_19 = arith.constant 0 : index
    %30 = vector.load %arg4[%c0_18, %c2, %c0_19] : memref<1x6x1024xf32, #tpu.memory_space<vmem>>, vector<1x1x1024xf32>
    %31 = vector.shape_cast %30 : vector<1x1x1024xf32> to vector<1x1024xf32>
    %cst_20 = arith.constant dense<0.000000e+00> : vector<1024xf32>
    %32 = vector.multi_reduction <add>, %8, %cst_20 [0] : vector<1x1024xf32> to vector<1024xf32>
    %33 = vector.shape_cast %32 : vector<1024xf32> to vector<1x1024xf32>
    %34 = arith.addf %31, %33 : vector<1x1024xf32>
    %c0_21 = arith.constant 0 : index
    %c2_22 = arith.constant 2 : index
    %c0_23 = arith.constant 0 : index
    %35 = vector.load %arg4[%c0_21, %c2_22, %c0_23] : memref<1x6x1024xf32, #tpu.memory_space<vmem>>, vector<1x1x1024xf32>
    %36 = vector.shape_cast %35 : vector<1x1x1024xf32> to vector<1x1024xf32>
    %37 = vector.shape_cast %34 : vector<1x1024xf32> to vector<1x1x1024xf32>
    tpu.vector_store %arg4[%c0_21, %c2_22, %c0_23], %37 {strides = array<i32>} : memref<1x6x1024xf32, #tpu.memory_space<vmem>>, vector<1x1x1024xf32>,
    %c0_24 = arith.constant 0 : index
    %c3 = arith.constant 3 : index
    %c0_25 = arith.constant 0 : index
    %38 = vector.load %arg4[%c0_24, %c3, %c0_25] : memref<1x6x1024xf32, #tpu.memory_space<vmem>>, vector<1x1x1024xf32>
    %39 = vector.shape_cast %38 : vector<1x1x1024xf32> to vector<1x1024xf32>
    %cst_26 = arith.constant dense<0.000000e+00> : vector<1024xf32>
    %40 = vector.multi_reduction <add>, %12, %cst_26 [0] : vector<1x1024xf32> to vector<1024xf32>
    %41 = vector.shape_cast %40 : vector<1024xf32> to vector<1x1024xf32>
    %42 = arith.addf %39, %41 : vector<1x1024xf32>
    %c0_27 = arith.constant 0 : index
    %c3_28 = arith.constant 3 : index
    %c0_29 = arith.constant 0 : index
    %43 = vector.load %arg4[%c0_27, %c3_28, %c0_29] : memref<1x6x1024xf32, #tpu.memory_space<vmem>>, vector<1x1x1024xf32>
    %44 = vector.shape_cast %43 : vector<1x1x1024xf32> to vector<1x1024xf32>
    %45 = vector.shape_cast %42 : vector<1x1024xf32> to vector<1x1x1024xf32>
    tpu.vector_store %arg4[%c0_27, %c3_28, %c0_29], %45 {strides = array<i32>} : memref<1x6x1024xf32, #tpu.memory_space<vmem>>, vector<1x1x1024xf32>,
    %c0_30 = arith.constant 0 : index
    %c4 = arith.constant 4 : index
    %c0_31 = arith.constant 0 : index
    %46 = vector.load %arg4[%c0_30, %c4, %c0_31] : memref<1x6x1024xf32, #tpu.memory_space<vmem>>, vector<1x1x1024xf32>
    %47 = vector.shape_cast %46 : vector<1x1x1024xf32> to vector<1x1024xf32>
    %48 = arith.mulf %3, %8 : vector<1x1024xf32>
    %cst_32 = arith.constant dense<0.000000e+00> : vector<1024xf32>
    %49 = vector.multi_reduction <add>, %48, %cst_32 [0] : vector<1x1024xf32> to vector<1024xf32>
    %50 = vector.shape_cast %49 : vector<1024xf32> to vector<1x1024xf32>
    %51 = arith.addf %47, %50 : vector<1x1024xf32>
    %c0_33 = arith.constant 0 : index
    %c4_34 = arith.constant 4 : index
    %c0_35 = arith.constant 0 : index
    %52 = vector.load %arg4[%c0_33, %c4_34, %c0_35] : memref<1x6x1024xf32, #tpu.memory_space<vmem>>, vector<1x1x1024xf32>
    %53 = vector.shape_cast %52 : vector<1x1x1024xf32> to vector<1x1024xf32>
    %54 = vector.shape_cast %51 : vector<1x1024xf32> to vector<1x1x1024xf32>
    tpu.vector_store %arg4[%c0_33, %c4_34, %c0_35], %54 {strides = array<i32>} : memref<1x6x1024xf32, #tpu.memory_space<vmem>>, vector<1x1x1024xf32>,
    %c0_36 = arith.constant 0 : index
    %c5 = arith.constant 5 : index
    %c0_37 = arith.constant 0 : index
    %55 = vector.load %arg4[%c0_36, %c5, %c0_37] : memref<1x6x1024xf32, #tpu.memory_space<vmem>>, vector<1x1x1024xf32>
    %56 = vector.shape_cast %55 : vector<1x1x1024xf32> to vector<1x1024xf32>
    %57 = arith.mulf %3, %12 : vector<1x1024xf32>
    %cst_38 = arith.constant dense<0.000000e+00> : vector<1024xf32>
    %58 = vector.multi_reduction <add>, %57, %cst_38 [0] : vector<1x1024xf32> to vector<1024xf32>
    %59 = vector.shape_cast %58 : vector<1024xf32> to vector<1x1024xf32>
    %60 = arith.addf %56, %59 : vector<1x1024xf32>
    %c0_39 = arith.constant 0 : index
    %c5_40 = arith.constant 5 : index
    %c0_41 = arith.constant 0 : index
    %61 = vector.load %arg4[%c0_39, %c5_40, %c0_41] : memref<1x6x1024xf32, #tpu.memory_space<vmem>>, vector<1x1x1024xf32>
    %62 = vector.shape_cast %61 : vector<1x1x1024xf32> to vector<1x1024xf32>
    %63 = vector.shape_cast %60 : vector<1x1024xf32> to vector<1x1x1024xf32>
    tpu.vector_store %arg4[%c0_39, %c5_40, %c0_41], %63 {strides = array<i32>} : memref<1x6x1024xf32, #tpu.memory_space<vmem>>, vector<1x1x1024xf32>,
    return
  }
  func.func @transform_0(%arg0: i32, %arg1: i32) -> (i32, i32) {
    %c1_i32 = arith.constant 1 : i32
    %0 = arith.muli %arg0, %c1_i32 : i32
    %1 = arith.addi %0, %arg1 : i32
    %c0_i32 = arith.constant 0 : i32
    %c0_i32_0 = arith.constant 0 : i32
    return %1, %c0_i32 : i32, i32
  }
  func.func @transform_1(%arg0: i32, %arg1: i32) -> (i32, i32) {
    %c1_i32 = arith.constant 1 : i32
    %0 = arith.muli %arg0, %c1_i32 : i32
    %1 = arith.addi %0, %arg1 : i32
    %c0_i32 = arith.constant 0 : i32
    %c0_i32_0 = arith.constant 0 : i32
    return %1, %c0_i32 : i32, i32
  }
  func.func @transform_2(%arg0: i32, %arg1: i32) -> (i32, i32, i32) {
    %c0_i32 = arith.constant 0 : i32
    %c0_i32_0 = arith.constant 0 : i32
    %c0_i32_1 = arith.constant 0 : i32
    return %arg0, %c0_i32, %c0_i32_0 : i32, i32, i32
  }
}

</mosaic_0001>

<bundles_post_ra>
// kernel: tpu_custom_call.1
= control target key start
LH: loop header
LB: loop body
LE: loop exit
PB: predicated region body
PF: predicated region fallthrough
CT: control target
= control target key end

     0   :  { %7 = vsyncpa [#allocation3], 0  ;;  %s332_s0 = inlined_call_operand.hbm [shape: f32[1,1024], index: 0, kind: input, shape index: {}]   ;;  %s333_s1 = inlined_call_operand.hbm [shape: f32[1,1024], index: 1, kind: input, shape index: {}]   ;;  %s334_s2 = inlined_call_operand.vmem [shape: f32[1,6,1024], index: 2, kind: output, shape index: {}]  }
   0x1   :  { %8 = vsyncpa [#allocation5], 0  ;;  %s194_s9 = smov [#allocation2]   ;;  %s195_s11 = smov [#allocation4]  }
   0x2   :  { %s19_s10 = sshll.u32 %s194_s9, 4  ;;  %s33_s12 = sshll.u32 %s195_s11, 4  ;;  %s20_s10 = int_to_ptr.vmem [resolvable:$true] %s19_s10  ;;  %s34_s12 = int_to_ptr.vmem [resolvable:$true] %s33_s12 }
   0x3   :  { %s146_s15 = scalar_lea.hbm %s332_s0, 128 }
   0x4   :  { %p147_p0 = scmp.ne.s32.totalorder %s332_s0, %s146_s15  ;;  %p150_p1 = scmp.lt.u32.totalorder %s146_s15, %s332_s0 }
   0x6   :  { %p152_p2 = pnand %p150_p1, %p147_p0 }
   0x8   :  { %155 = shalt.err (!%p152_p2)
}
   0x9   :  { %s156_s20 = scalar_lea.vmem %s20_s10, 128  ;;  %p161_p4 = scmp.lt.s32.totalorder %s20_s10, %s20_s10 }
   0xa   :  { %p157_p3 = scmp.ne.s32.totalorder %s20_s10, %s156_s20  ;;  %p162_p5 = scmp.lt.s32.totalorder %s156_s20, %s156_s20 }
   0xc   :  { %p163_p6 = por %p162_p5, %p161_p4 }
   0xe   :  { %p164_p7 = pnand %p163_p6, %p157_p3 }
  0x10   :  { %167 = shalt.err (!%p164_p7)
}
  0x11   :  { %22 = dma.hbm_to_vmem [thread:$0]  %s332_s0, 128, %s20_s10, [#allocation3]  }
  0x12   :  { %s168_s25 = scalar_lea.hbm %s333_s1, 128 }
  0x13   :  { %p169_p8 = scmp.ne.s32.totalorder %s333_s1, %s168_s25  ;;  %p172_p9 = scmp.lt.u32.totalorder %s168_s25, %s333_s1 }
  0x15   :  { %p174_p10 = pnand %p172_p9, %p169_p8 }
  0x17   :  { %177 = shalt.err (!%p174_p10)
}
  0x18   :  { %s178_s30 = scalar_lea.vmem %s34_s12, 128  ;;  %p183_p12 = scmp.lt.s32.totalorder %s34_s12, %s34_s12 }
  0x19   :  { %p179_p11 = scmp.ne.s32.totalorder %s34_s12, %s178_s30  ;;  %p184_p13 = scmp.lt.s32.totalorder %s178_s30, %s178_s30 }
  0x1b   :  { %p185_p0 = por %p184_p13, %p183_p12 }
  0x1d   :  { %p186_p1 = pnand %p185_p0, %p179_p11 }
  0x1f   :  { %189 = shalt.err (!%p186_p1)
}
  0x20   :  { %36 = dma.hbm_to_vmem [thread:$0]  %s333_s1, 128, %s34_s12, [#allocation5]  }
  0x21   :  { %190 = dma.done.wait [#allocation3], 128  }
  0x22   :  { %191 = vsyncadd [#allocation3], 4294967168 }
  0x23   :  { %192 = dma.done.wait [#allocation5], 128  }
  0x24   :  { %193 = vsyncadd [#allocation5], 4294967168  ;;  %v196_v0 = vmov 0.0   ;;  %v57_v1 = vld [vmem:[#allocation2] sm:$0xff]  ;;  %v58_v2 = vld [vmem:[#allocation4] sm:$0xff] }
  0x25   :  { %49 = vst [vmem:[%s334_s2] sm:$0x3f] %v196_v0  ;;  %50 = vst [vmem:[%s334_s2 + $0x8] sm:$0x3f] %v196_v0  ;;  %v76_v5 = vmul.f32 %v57_v1, %v57_v1  ;;  %vm59_vm0 = vcmp.eq.f32.partialorder %v58_v2, 0.0  ;;  %vm62_vm1 = vcmp.eq.f32.partialorder %v58_v2, 1.0 }
  0x26   :  { %51 = vst [vmem:[%s334_s2 + $0x10] sm:$0x3f] %v196_v0  ;;  %52 = vst [vmem:[%s334_s2 + $0x18] sm:$0x3f] %v196_v0  ;;  %v121_v12 = vsel %vm59_vm0, 1.0, %v196_v0  ;;  %v122_v14 = vsel %vm62_vm1, 1.0, %v196_v0 }
  0x27   :  { %53 = vst [vmem:[%s334_s2 + $0x20] sm:$0x3f] %v196_v0  ;;  %54 = vst [vmem:[%s334_s2 + $0x28] sm:$0x3f] %v196_v0  ;;  %v101_v19 = vmul.f32 %v121_v12, %v57_v1  ;;  %v110_v23 = vmul.f32 %v122_v14, %v57_v1 }
  0x28   :  { %55 = vst [vmem:[%s334_s2 + $0x30] sm:$0x3f] %v196_v0  ;;  %56 = vst [vmem:[%s334_s2 + $0x38] sm:$0x3f] %v196_v0 }
  0x2d   :  { %v65_v3 = vld [vmem:[%s334_s2] ss:$8 sm:$0xf]  ;;  %v123_v7 = vld [vmem:[%s334_s2 + $0x1] ss:$8 sm:$0xf] }
  0x2e   :  { %v127_v10 = vld [vmem:[%s334_s2 + $0x2] ss:$8 sm:$0xf]  ;;  %v131_v17 = vld [vmem:[%s334_s2 + $0x3] ss:$8 sm:$0xf] }
  0x2f   :  { %v66_v4 = vld [vmem:[%s334_s2] ss:$8 sm:$0xf0]  ;;  %v124_v8 = vld [vmem:[%s334_s2 + $0x1] ss:$8 sm:$0xf0] }
  0x30   :  { %v67_v6 = vor.u32 %v66_v4, %v65_v3  ;;  %v75_v9 = vor.u32 %v124_v8, %v123_v7  ;;  %v128_v13 = vld [vmem:[%s334_s2 + $0x2] ss:$8 sm:$0xf0]  ;;  %v132_v18 = vld [vmem:[%s334_s2 + $0x3] ss:$8 sm:$0xf0] }
  0x31   :  { %v84_v16 = vor.u32 %v128_v13, %v127_v10  ;;  %v92_v20 = vor.u32 %v132_v18, %v131_v17  ;;  %v135_v21 = vld [vmem:[%s334_s2 + $0x4] ss:$8 sm:$0xf]  ;;  %v139_v26 = vld [vmem:[%s334_s2 + $0x5] ss:$8 sm:$0xf] }
  0x32   :  { %v69_v11 = vadd.f32 %v67_v6, %v57_v1  ;;  %v78_v15 = vadd.f32 %v76_v5, %v75_v9  ;;  %v136_v22 = vld [vmem:[%s334_s2 + $0x4] ss:$8 sm:$0xf0]  ;;  %v140_v27 = vld [vmem:[%s334_s2 + $0x5] ss:$8 sm:$0xf0] }
  0x33   :  { %v86_v24 = vadd.f32 %v121_v12, %v84_v16  ;;  %v100_v25 = vor.u32 %v136_v22, %v135_v21  ;;  %v94_v28 = vadd.f32 %v122_v14, %v92_v20  ;;  %v109_v29 = vor.u32 %v140_v27, %v139_v26 }
  0x34   :  { %70 = vst [vmem:[%s334_s2] ss:$8 sm:$0xf] %v69_v11  ;;  %71 = vst [vmem:[%s334_s2] ss:$8 sm:$0xf0] %v69_v11 }
  0x35   :  { %125 = vst [vmem:[%s334_s2 + $0x1] ss:$8 sm:$0xf] %v78_v15  ;;  %126 = vst [vmem:[%s334_s2 + $0x1] ss:$8 sm:$0xf0] %v78_v15  ;;  %v103_v30 = vadd.f32 %v101_v19, %v100_v25  ;;  %v112_v31 = vadd.f32 %v110_v23, %v109_v29 }
  0x36   :  { %129 = vst [vmem:[%s334_s2 + $0x2] ss:$8 sm:$0xf] %v86_v24  ;;  %130 = vst [vmem:[%s334_s2 + $0x2] ss:$8 sm:$0xf0] %v86_v24 }
  0x37   :  { %133 = vst [vmem:[%s334_s2 + $0x3] ss:$8 sm:$0xf] %v94_v28  ;;  %134 = vst [vmem:[%s334_s2 + $0x3] ss:$8 sm:$0xf0] %v94_v28 }
  0x38   :  { %137 = vst [vmem:[%s334_s2 + $0x4] ss:$8 sm:$0xf] %v103_v30  ;;  %138 = vst [vmem:[%s334_s2 + $0x4] ss:$8 sm:$0xf0] %v103_v30 }
  0x39   :  { %141 = vst [vmem:[%s334_s2 + $0x5] ss:$8 sm:$0xf] %v112_v31  ;;  %142 = vst [vmem:[%s334_s2 + $0x5] ss:$8 sm:$0xf0] %v112_v31 }
  0x3a   :  { %119 = vsyncpa [#allocation3], 1 }
  0x3b   :  { %120 = vsyncpa [#allocation5], 1 }

</bundles_post_ra>
